<compile_context>
chip_gen: v6e
topology: v6e:2x2x1
jax: 0.10.0
libtpu: 0.0.40
codegen_flags: <defaults>
</compile_context>

<pallas_src>
import functools

import jax
import jax.numpy as jnp
from jax.experimental import pallas as pl
from jax.experimental.pallas import tpu as pltpu


LANE = 128


def _ceil8(n):
    return -(-n // 8) * 8


# ----------------------------- Pallas kernel ------------------------------- #
def textrnn_kernel(tok_ref,        # (B, T)             int32  SMEM
                   emb_ref,        # (V, E)             f32    VMEM
                   w_rec_ref,      # (4*ceil8(dim), H)  f32    VMEM  [wih1; whh1; wih2; whh2]
                   w_head_ref,     # (ceil8(H)+128,128) f32    VMEM  [fc1_w pad; fc2_w pad]
                   b_ref,          # (8, 128)           f32    VMEM  rows: b1, b2, fc1_b, fc2_b
                   out_ref,        # (B_pad, 128)       f32    VMEM
                   x_ref,          # (T*B_pad, E)       f32    VMEM scratch
                   *, B, T, B_pad, E, H,
                   off_whh1, off_wih2, off_whh2, off_fc2):
    # ---- fused embedding lookup: time-major (T*B_pad, E), padded rows stay zero ----
    x_ref[...] = jnp.zeros_like(x_ref)
    for t in range(T):
        for b in range(B):
            tok = tok_ref[b, t]                                    # SMEM scalar read
            x_ref[pl.ds(t * B_pad + b, 1), :] = emb_ref[pl.ds(tok, 1), :]

    wih1 = w_rec_ref[0:E, :]
    whh1 = w_rec_ref[off_whh1:off_whh1 + H, :]
    wih2 = w_rec_ref[off_wih2:off_wih2 + H, :]
    whh2 = w_rec_ref[off_whh2:off_whh2 + H, :]
    b1 = b_ref[0:1, :H]
    b2 = jnp.broadcast_to(b_ref[1:2, :H], (B_pad, H))              # hoisted broadcast
    fc1b = b_ref[2:3, :]
    fc2b = b_ref[3:4, :]

    # Hoisted layer-1 input projection over ALL timesteps (one MXU pass), bias folded.
    x1 = jnp.dot(x_ref[...], wih1, preferred_element_type=jnp.float32) + b1   # (T*B_pad, H)

    h1 = jnp.zeros((B_pad, H), jnp.float32)
    h2 = jnp.zeros((B_pad, H), jnp.float32)

    # Fully unrolled 2-layer tanh recurrence, all f32; no concat / casts on the chain.
    for t in range(T):
        x1_t = x1[t * B_pad:(t + 1) * B_pad, :]                    # static slice
        # h2_{t-1} contribution depends only on the previous step -> overlaps layer-1 tanh.
        rec2 = jnp.dot(h2, whh2, preferred_element_type=jnp.float32) + b2
        h1 = jnp.tanh(x1_t + jnp.dot(h1, whh1, preferred_element_type=jnp.float32))
        # TODO(synk): nn.RNN applies dropout(0.5) between layers only in training mode;
        # deterministic eval-mode semantics are implemented here.
        h2 = jnp.tanh(jnp.dot(h1, wih2, preferred_element_type=jnp.float32) + rec2)

    # seq_net head on the final layer-2 state: Linear(H,64) -> ReLU -> Linear(64,C),
    # computed with lane-dense 128-wide intermediates and an unmasked 128-lane store.
    hid = jnp.maximum(
        jnp.dot(h2, w_head_ref[0:H, :], preferred_element_type=jnp.float32) + fc1b, 0.0)
    out_ref[...] = (jnp.dot(hid, w_head_ref[off_fc2:off_fc2 + LANE, :],
                            preferred_element_type=jnp.float32) + fc2b)


# ------------------------------ host wrapper ------------------------------- #
def textrnn_forward(tokens, params, *, num_classes):
    """tokens: (B, T) int32.  Returns logits (B, num_classes) f32."""
    B, T = tokens.shape
    _, E = params["embedding"].shape
    H = params["w_rec"].shape[1]
    B_pad = max(8, _ceil8(B))

    off_whh1 = _ceil8(E)
    off_wih2 = off_whh1 + _ceil8(H)
    off_whh2 = off_wih2 + _ceil8(H)
    off_fc2 = _ceil8(H)

    kernel = functools.partial(
        textrnn_kernel, B=B, T=T, B_pad=B_pad, E=E, H=H,
        off_whh1=off_whh1, off_wih2=off_wih2, off_whh2=off_whh2, off_fc2=off_fc2)

    vmem = pl.BlockSpec(memory_space=pltpu.MemorySpace.VMEM)
    smem = pl.BlockSpec(memory_space=pltpu.MemorySpace.SMEM)
    out = pl.pallas_call(
        kernel,
        out_shape=jax.ShapeDtypeStruct((B_pad, LANE), jnp.float32),
        in_specs=[smem, vmem, vmem, vmem, vmem],
        out_specs=vmem,
        scratch_shapes=[pltpu.VMEM((T * B_pad, E), jnp.float32)],
    )(tokens, params["embedding"], params["w_rec"], params["w_head"], params["biases"])
    return out[:B, :num_classes]


# --------------------------- parameter construction ------------------------ #
def init_params(key, vocab_size, emb_dim, hidden, classes):
    """All weight packing happens here, once, NOT on the per-call path."""
    assert hidden <= LANE and classes <= LANE
    ks = jax.random.split(key, 13)
    u = lambda k, shape, bound: jax.random.uniform(
        k, shape, jnp.float32, minval=-bound, maxval=bound)
    kr = hidden ** -0.5      # nn.RNN init bound
    k1 = hidden ** -0.5      # Linear(hidden, 64) bound
    k2 = 64 ** -0.5          # Linear(64, classes) bound

    emb = jax.random.normal(ks[0], (vocab_size, emb_dim), jnp.float32)   # nn.Embedding ~ N(0,1)

    wih1 = u(ks[1], (emb_dim, hidden), kr)        # stored transposed: applied as x @ wih1
    whh1 = u(ks[2], (hidden, hidden), kr)
    wih2 = u(ks[3], (hidden, hidden), kr)
    whh2 = u(ks[4], (hidden, hidden), kr)
    b1 = u(ks[5], (hidden,), kr) + u(ks[6], (hidden,), kr)    # b_ih + b_hh (layer 1)
    b2 = u(ks[7], (hidden,), kr) + u(ks[8], (hidden,), kr)    # b_ih + b_hh (layer 2)
    fc1_w = u(ks[9], (hidden, 64), k1)
    fc1_b = u(ks[10], (64,), k1)
    fc2_w = u(ks[11], (64, classes), k2)
    fc2_b = u(ks[12], (classes,), k2)

    # Pack recurrence weights: rows [wih1; whh1; wih2; whh2], each 8-row aligned.
    mats = (wih1, whh1, wih2, whh2)
    offs, rows = [], 0
    for m in mats:
        offs.append(rows)
        rows += _ceil8(m.shape[0])
    w_rec = jnp.zeros((rows, hidden), jnp.float32)
    for off, m in zip(offs, mats):
        w_rec = w_rec.at[off:off + m.shape[0], :].set(m)

    # Pack head weights lane-dense (128 cols): [fc1_w | 0] stacked on [fc2_w | 0; 0].
    fc1_wp = jnp.zeros((_ceil8(hidden), LANE), jnp.float32).at[:hidden, :64].set(fc1_w)
    fc2_wp = jnp.zeros((LANE, LANE), jnp.float32).at[:64, :classes].set(fc2_w)
    w_head = jnp.concatenate([fc1_wp, fc2_wp], axis=0)

    # Pack all biases into one (8, 128) slab.
    biases = jnp.zeros((8, LANE), jnp.float32)
    biases = biases.at[0, :hidden].set(b1)
    biases = biases.at[1, :hidden].set(b2)
    biases = biases.at[2, :64].set(fc1_b)
    biases = biases.at[3, :classes].set(fc2_b)

    return {"embedding": emb, "w_rec": w_rec, "w_head": w_head, "biases": biases}


# ------------------------ pure-JAX reference (check) ------------------------ #
def textrnn_reference(tokens, params, num_classes):
    emb = params["embedding"]
    E = emb.shape[1]
    H = params["w_rec"].shape[1]
    o1 = _ceil8(E)
    o2 = o1 + _ceil8(H)
    o3 = o2 + _ceil8(H)
    wih1 = params["w_rec"][0:E]
    whh1 = params["w_rec"][o1:o1 + H]
    wih2 = params["w_rec"][o2:o2 + H]
    whh2 = params["w_rec"][o3:o3 + H]
    b1 = params["biases"][0, :H]
    b2 = params["biases"][1, :H]
    fc1w = params["w_head"][0:H, :64]
    fc1b = params["biases"][2, :64]
    of2 = _ceil8(H)
    fc2w = params["w_head"][of2:of2 + 64, :num_classes]
    fc2b = params["biases"][3, :num_classes]

    x = emb[tokens]                                   # (B, T, E)
    B, T, _ = x.shape
    h1 = jnp.zeros((B, H), jnp.float32)
    h2 = jnp.zeros((B, H), jnp.float32)
    for t in range(T):
        h1 = jnp.tanh(x[:, t] @ wih1 + h1 @ whh1 + b1)
        h2 = jnp.tanh(h1 @ wih2 + h2 @ whh2 + b2)
    hid = jnp.maximum(h2 @ fc1w + fc1b, 0.0)
    return hid @ fc2w + fc2b


# ----------------------------------- main ----------------------------------- #
if __name__ == "__main__":
    VOCAB, EMB, HIDDEN, CLASSES = 50, 32, 32, 4
    B, T = 2, 8

    key = jax.random.PRNGKey(0)
    k_tok, k_par = jax.random.split(key)
    tokens = jax.random.randint(k_tok, (B, T), 0, VOCAB, dtype=jnp.int32)
    params = init_params(k_par, VOCAB, EMB, HIDDEN, CLASSES)

    fwd = jax.jit(functools.partial(textrnn_forward, num_classes=CLASSES))
    logits = fwd(tokens, params)
    jax.block_until_ready(logits)

    assert logits.shape == (B, CLASSES) and logits.dtype == jnp.float32
    ref = textrnn_reference(tokens, params, CLASSES)
    assert bool(jnp.all(jnp.abs(logits - ref) < 0.1)), "kernel deviates from reference"
    print("KERNEL_OK")
</pallas_src>

<mosaic_0001>
module attributes {stable_mosaic.version = 11 : i64} {
  func.func @textrnn_kernel(%arg0: memref<2x8xi32, #tpu.memory_space<smem>>, %arg1: memref<50x32xf32, #tpu.memory_space<vmem>>, %arg2: memref<128x32xf32, #tpu.memory_space<vmem>>, %arg3: memref<160x128xf32, #tpu.memory_space<vmem>>, %arg4: memref<8x128xf32, #tpu.memory_space<vmem>>, %arg5: memref<8x128xf32, #tpu.memory_space<vmem>>, %arg6: memref<64x32xf32, #tpu.memory_space<vmem>>) attributes {dimension_semantics = [], scalar_prefetch = 0 : i64, scratch_operands = 1 : i64, tpu.core_type = #tpu.core_type<tc>} {
    %cst = arith.constant 0.000000e+00 : f32
    %0 = vector.broadcast %cst : f32 to vector<64x32xf32>
    %c0 = arith.constant 0 : index
    %c0_0 = arith.constant 0 : index
    %1 = vector.load %arg6[%c0, %c0_0] : memref<64x32xf32, #tpu.memory_space<vmem>>, vector<64x32xf32>
    tpu.vector_store %arg6[%c0, %c0_0], %0 {strides = array<i32>} : memref<64x32xf32, #tpu.memory_space<vmem>>, vector<64x32xf32>,
    %c0_1 = arith.constant 0 : index
    %c0_2 = arith.constant 0 : index
    %2 = memref.load %arg0[%c0_1, %c0_2] : memref<2x8xi32, #tpu.memory_space<smem>>
    %3 = arith.index_cast %2 : i32 to index
    %c0_3 = arith.constant 0 : index
    %4 = vector.load %arg1[%3, %c0_3] : memref<50x32xf32, #tpu.memory_space<vmem>>, vector<1x32xf32>
    %c0_4 = arith.constant 0 : index
    %c0_5 = arith.constant 0 : index
    %5 = vector.load %arg6[%c0_4, %c0_5] : memref<64x32xf32, #tpu.memory_space<vmem>>, vector<1x32xf32>
    tpu.vector_store %arg6[%c0_4, %c0_5], %4 {strides = array<i32>} : memref<64x32xf32, #tpu.memory_space<vmem>>, vector<1x32xf32>,
    %c1 = arith.constant 1 : index
    %c0_6 = arith.constant 0 : index
    %6 = memref.load %arg0[%c1, %c0_6] : memref<2x8xi32, #tpu.memory_space<smem>>
    %7 = arith.index_cast %6 : i32 to index
    %c0_7 = arith.constant 0 : index
    %8 = vector.load %arg1[%7, %c0_7] : memref<50x32xf32, #tpu.memory_space<vmem>>, vector<1x32xf32>
    %c1_8 = arith.constant 1 : index
    %c0_9 = arith.constant 0 : index
    %9 = vector.load %arg6[%c1_8, %c0_9] : memref<64x32xf32, #tpu.memory_space<vmem>>, vector<1x32xf32>
    tpu.vector_store %arg6[%c1_8, %c0_9], %8 {strides = array<i32>} : memref<64x32xf32, #tpu.memory_space<vmem>>, vector<1x32xf32>,
    %c0_10 = arith.constant 0 : index
    %c1_11 = arith.constant 1 : index
    %10 = memref.load %arg0[%c0_10, %c1_11] : memref<2x8xi32, #tpu.memory_space<smem>>
    %11 = arith.index_cast %10 : i32 to index
    %c0_12 = arith.constant 0 : index
    %12 = vector.load %arg1[%11, %c0_12] : memref<50x32xf32, #tpu.memory_space<vmem>>, vector<1x32xf32>
    %c8 = arith.constant 8 : index
    %c0_13 = arith.constant 0 : index
    %13 = vector.load %arg6[%c8, %c0_13] : memref<64x32xf32, #tpu.memory_space<vmem>>, vector<1x32xf32>
    tpu.vector_store %arg6[%c8, %c0_13], %12 {strides = array<i32>} : memref<64x32xf32, #tpu.memory_space<vmem>>, vector<1x32xf32>,
    %c1_14 = arith.constant 1 : index
    %c1_15 = arith.constant 1 : index
    %14 = memref.load %arg0[%c1_14, %c1_15] : memref<2x8xi32, #tpu.memory_space<smem>>
    %15 = arith.index_cast %14 : i32 to index
    %c0_16 = arith.constant 0 : index
    %16 = vector.load %arg1[%15, %c0_16] : memref<50x32xf32, #tpu.memory_space<vmem>>, vector<1x32xf32>
    %c9 = arith.constant 9 : index
    %c0_17 = arith.constant 0 : index
    %17 = vector.load %arg6[%c9, %c0_17] : memref<64x32xf32, #tpu.memory_space<vmem>>, vector<1x32xf32>
    tpu.vector_store %arg6[%c9, %c0_17], %16 {strides = array<i32>} : memref<64x32xf32, #tpu.memory_space<vmem>>, vector<1x32xf32>,
    %c0_18 = arith.constant 0 : index
    %c2 = arith.constant 2 : index
    %18 = memref.load %arg0[%c0_18, %c2] : memref<2x8xi32, #tpu.memory_space<smem>>
    %19 = arith.index_cast %18 : i32 to index
    %c0_19 = arith.constant 0 : index
    %20 = vector.load %arg1[%19, %c0_19] : memref<50x32xf32, #tpu.memory_space<vmem>>, vector<1x32xf32>
    %c16 = arith.constant 16 : index
    %c0_20 = arith.constant 0 : index
    %21 = vector.load %arg6[%c16, %c0_20] : memref<64x32xf32, #tpu.memory_space<vmem>>, vector<1x32xf32>
    tpu.vector_store %arg6[%c16, %c0_20], %20 {strides = array<i32>} : memref<64x32xf32, #tpu.memory_space<vmem>>, vector<1x32xf32>,
    %c1_21 = arith.constant 1 : index
    %c2_22 = arith.constant 2 : index
    %22 = memref.load %arg0[%c1_21, %c2_22] : memref<2x8xi32, #tpu.memory_space<smem>>
    %23 = arith.index_cast %22 : i32 to index
    %c0_23 = arith.constant 0 : index
    %24 = vector.load %arg1[%23, %c0_23] : memref<50x32xf32, #tpu.memory_space<vmem>>, vector<1x32xf32>
    %c17 = arith.constant 17 : index
    %c0_24 = arith.constant 0 : index
    %25 = vector.load %arg6[%c17, %c0_24] : memref<64x32xf32, #tpu.memory_space<vmem>>, vector<1x32xf32>
    tpu.vector_store %arg6[%c17, %c0_24], %24 {strides = array<i32>} : memref<64x32xf32, #tpu.memory_space<vmem>>, vector<1x32xf32>,
    %c0_25 = arith.constant 0 : index
    %c3 = arith.constant 3 : index
    %26 = memref.load %arg0[%c0_25, %c3] : memref<2x8xi32, #tpu.memory_space<smem>>
    %27 = arith.index_cast %26 : i32 to index
    %c0_26 = arith.constant 0 : index
    %28 = vector.load %arg1[%27, %c0_26] : memref<50x32xf32, #tpu.memory_space<vmem>>, vector<1x32xf32>
    %c24 = arith.constant 24 : index
    %c0_27 = arith.constant 0 : index
    %29 = vector.load %arg6[%c24, %c0_27] : memref<64x32xf32, #tpu.memory_space<vmem>>, vector<1x32xf32>
    tpu.vector_store %arg6[%c24, %c0_27], %28 {strides = array<i32>} : memref<64x32xf32, #tpu.memory_space<vmem>>, vector<1x32xf32>,
    %c1_28 = arith.constant 1 : index
    %c3_29 = arith.constant 3 : index
    %30 = memref.load %arg0[%c1_28, %c3_29] : memref<2x8xi32, #tpu.memory_space<smem>>
    %31 = arith.index_cast %30 : i32 to index
    %c0_30 = arith.constant 0 : index
    %32 = vector.load %arg1[%31, %c0_30] : memref<50x32xf32, #tpu.memory_space<vmem>>, vector<1x32xf32>
    %c25 = arith.constant 25 : index
    %c0_31 = arith.constant 0 : index
    %33 = vector.load %arg6[%c25, %c0_31] : memref<64x32xf32, #tpu.memory_space<vmem>>, vector<1x32xf32>
    tpu.vector_store %arg6[%c25, %c0_31], %32 {strides = array<i32>} : memref<64x32xf32, #tpu.memory_space<vmem>>, vector<1x32xf32>,
    %c0_32 = arith.constant 0 : index
    %c4 = arith.constant 4 : index
    %34 = memref.load %arg0[%c0_32, %c4] : memref<2x8xi32, #tpu.memory_space<smem>>
    %35 = arith.index_cast %34 : i32 to index
    %c0_33 = arith.constant 0 : index
    %36 = vector.load %arg1[%35, %c0_33] : memref<50x32xf32, #tpu.memory_space<vmem>>, vector<1x32xf32>
    %c32 = arith.constant 32 : index
    %c0_34 = arith.constant 0 : index
    %37 = vector.load %arg6[%c32, %c0_34] : memref<64x32xf32, #tpu.memory_space<vmem>>, vector<1x32xf32>
    tpu.vector_store %arg6[%c32, %c0_34], %36 {strides = array<i32>} : memref<64x32xf32, #tpu.memory_space<vmem>>, vector<1x32xf32>,
    %c1_35 = arith.constant 1 : index
    %c4_36 = arith.constant 4 : index
    %38 = memref.load %arg0[%c1_35, %c4_36] : memref<2x8xi32, #tpu.memory_space<smem>>
    %39 = arith.index_cast %38 : i32 to index
    %c0_37 = arith.constant 0 : index
    %40 = vector.load %arg1[%39, %c0_37] : memref<50x32xf32, #tpu.memory_space<vmem>>, vector<1x32xf32>
    %c33 = arith.constant 33 : index
    %c0_38 = arith.constant 0 : index
    %41 = vector.load %arg6[%c33, %c0_38] : memref<64x32xf32, #tpu.memory_space<vmem>>, vector<1x32xf32>
    tpu.vector_store %arg6[%c33, %c0_38], %40 {strides = array<i32>} : memref<64x32xf32, #tpu.memory_space<vmem>>, vector<1x32xf32>,
    %c0_39 = arith.constant 0 : index
    %c5 = arith.constant 5 : index
    %42 = memref.load %arg0[%c0_39, %c5] : memref<2x8xi32, #tpu.memory_space<smem>>
    %43 = arith.index_cast %42 : i32 to index
    %c0_40 = arith.constant 0 : index
    %44 = vector.load %arg1[%43, %c0_40] : memref<50x32xf32, #tpu.memory_space<vmem>>, vector<1x32xf32>
    %c40 = arith.constant 40 : index
    %c0_41 = arith.constant 0 : index
    %45 = vector.load %arg6[%c40, %c0_41] : memref<64x32xf32, #tpu.memory_space<vmem>>, vector<1x32xf32>
    tpu.vector_store %arg6[%c40, %c0_41], %44 {strides = array<i32>} : memref<64x32xf32, #tpu.memory_space<vmem>>, vector<1x32xf32>,
    %c1_42 = arith.constant 1 : index
    %c5_43 = arith.constant 5 : index
    %46 = memref.load %arg0[%c1_42, %c5_43] : memref<2x8xi32, #tpu.memory_space<smem>>
    %47 = arith.index_cast %46 : i32 to index
    %c0_44 = arith.constant 0 : index
    %48 = vector.load %arg1[%47, %c0_44] : memref<50x32xf32, #tpu.memory_space<vmem>>, vector<1x32xf32>
    %c41 = arith.constant 41 : index
    %c0_45 = arith.constant 0 : index
    %49 = vector.load %arg6[%c41, %c0_45] : memref<64x32xf32, #tpu.memory_space<vmem>>, vector<1x32xf32>
    tpu.vector_store %arg6[%c41, %c0_45], %48 {strides = array<i32>} : memref<64x32xf32, #tpu.memory_space<vmem>>, vector<1x32xf32>,
    %c0_46 = arith.constant 0 : index
    %c6 = arith.constant 6 : index
    %50 = memref.load %arg0[%c0_46, %c6] : memref<2x8xi32, #tpu.memory_space<smem>>
    %51 = arith.index_cast %50 : i32 to index
    %c0_47 = arith.constant 0 : index
    %52 = vector.load %arg1[%51, %c0_47] : memref<50x32xf32, #tpu.memory_space<vmem>>, vector<1x32xf32>
    %c48 = arith.constant 48 : index
    %c0_48 = arith.constant 0 : index
    %53 = vector.load %arg6[%c48, %c0_48] : memref<64x32xf32, #tpu.memory_space<vmem>>, vector<1x32xf32>
    tpu.vector_store %arg6[%c48, %c0_48], %52 {strides = array<i32>} : memref<64x32xf32, #tpu.memory_space<vmem>>, vector<1x32xf32>,
    %c1_49 = arith.constant 1 : index
    %c6_50 = arith.constant 6 : index
    %54 = memref.load %arg0[%c1_49, %c6_50] : memref<2x8xi32, #tpu.memory_space<smem>>
    %55 = arith.index_cast %54 : i32 to index
    %c0_51 = arith.constant 0 : index
    %56 = vector.load %arg1[%55, %c0_51] : memref<50x32xf32, #tpu.memory_space<vmem>>, vector<1x32xf32>
    %c49 = arith.constant 49 : index
    %c0_52 = arith.constant 0 : index
    %57 = vector.load %arg6[%c49, %c0_52] : memref<64x32xf32, #tpu.memory_space<vmem>>, vector<1x32xf32>
    tpu.vector_store %arg6[%c49, %c0_52], %56 {strides = array<i32>} : memref<64x32xf32, #tpu.memory_space<vmem>>, vector<1x32xf32>,
    %c0_53 = arith.constant 0 : index
    %c7 = arith.constant 7 : index
    %58 = memref.load %arg0[%c0_53, %c7] : memref<2x8xi32, #tpu.memory_space<smem>>
    %59 = arith.index_cast %58 : i32 to index
    %c0_54 = arith.constant 0 : index
    %60 = vector.load %arg1[%59, %c0_54] : memref<50x32xf32, #tpu.memory_space<vmem>>, vector<1x32xf32>
    %c56 = arith.constant 56 : index
    %c0_55 = arith.constant 0 : index
    %61 = vector.load %arg6[%c56, %c0_55] : memref<64x32xf32, #tpu.memory_space<vmem>>, vector<1x32xf32>
    tpu.vector_store %arg6[%c56, %c0_55], %60 {strides = array<i32>} : memref<64x32xf32, #tpu.memory_space<vmem>>, vector<1x32xf32>,
    %c1_56 = arith.constant 1 : index
    %c7_57 = arith.constant 7 : index
    %62 = memref.load %arg0[%c1_56, %c7_57] : memref<2x8xi32, #tpu.memory_space<smem>>
    %63 = arith.index_cast %62 : i32 to index
    %c0_58 = arith.constant 0 : index
    %64 = vector.load %arg1[%63, %c0_58] : memref<50x32xf32, #tpu.memory_space<vmem>>, vector<1x32xf32>
    %c57 = arith.constant 57 : index
    %c0_59 = arith.constant 0 : index
    %65 = vector.load %arg6[%c57, %c0_59] : memref<64x32xf32, #tpu.memory_space<vmem>>, vector<1x32xf32>
    tpu.vector_store %arg6[%c57, %c0_59], %64 {strides = array<i32>} : memref<64x32xf32, #tpu.memory_space<vmem>>, vector<1x32xf32>,
    %c0_60 = arith.constant 0 : index
    %c0_61 = arith.constant 0 : index
    %66 = vector.load %arg2[%c0_60, %c0_61] : memref<128x32xf32, #tpu.memory_space<vmem>>, vector<32x32xf32>
    %c32_62 = arith.constant 32 : index
    %c0_63 = arith.constant 0 : index
    %67 = vector.load %arg2[%c32_62, %c0_63] : memref<128x32xf32, #tpu.memory_space<vmem>>, vector<32x32xf32>
    %c64 = arith.constant 64 : index
    %c0_64 = arith.constant 0 : index
    %68 = vector.load %arg2[%c64, %c0_64] : memref<128x32xf32, #tpu.memory_space<vmem>>, vector<32x32xf32>
    %c96 = arith.constant 96 : index
    %c0_65 = arith.constant 0 : index
    %69 = vector.load %arg2[%c96, %c0_65] : memref<128x32xf32, #tpu.memory_space<vmem>>, vector<32x32xf32>
    %c0_66 = arith.constant 0 : index
    %c0_67 = arith.constant 0 : index
    %70 = vector.load %arg4[%c0_66, %c0_67] : memref<8x128xf32, #tpu.memory_space<vmem>>, vector<1x32xf32>
    %c1_68 = arith.constant 1 : index
    %c0_69 = arith.constant 0 : index
    %71 = vector.load %arg4[%c1_68, %c0_69] : memref<8x128xf32, #tpu.memory_space<vmem>>, vector<1x32xf32>
    %72 = vector.shape_cast %71 : vector<1x32xf32> to vector<1x32xf32>
    %73 = vector.broadcast %72 : vector<1x32xf32> to vector<8x32xf32>
    %c2_70 = arith.constant 2 : index
    %c0_71 = arith.constant 0 : index
    %74 = vector.load %arg4[%c2_70, %c0_71] : memref<8x128xf32, #tpu.memory_space<vmem>>, vector<1x128xf32>
    %c3_72 = arith.constant 3 : index
    %c0_73 = arith.constant 0 : index
    %75 = vector.load %arg4[%c3_72, %c0_73] : memref<8x128xf32, #tpu.memory_space<vmem>>, vector<1x128xf32>
    %c0_74 = arith.constant 0 : index
    %c0_75 = arith.constant 0 : index
    %76 = vector.load %arg6[%c0_74, %c0_75] : memref<64x32xf32, #tpu.memory_space<vmem>>, vector<64x32xf32>
    %cst_76 = arith.constant dense<0.000000e+00> : vector<64x32xf32>
    %77 = tpu.matmul %76, %66, %cst_76 {dimension_numbers = #tpu.dot_dimension_numbers<[1], [0], [0], [1], [0, 0, 1, 1], [], []>} : vector<64x32xf32>, vector<32x32xf32>, vector<64x32xf32> -> vector<64x32xf32>
    %78 = vector.broadcast %70 : vector<1x32xf32> to vector<64x32xf32>
    %79 = arith.addf %77, %78 : vector<64x32xf32>
    %cst_77 = arith.constant 0.000000e+00 : f32
    %80 = vector.broadcast %cst_77 : f32 to vector<8x32xf32>
    %cst_78 = arith.constant 0.000000e+00 : f32
    %81 = vector.broadcast %cst_78 : f32 to vector<8x32xf32>
    %82 = vector.extract_strided_slice %79 {offsets = [0, 0], sizes = [8, 32], strides = [1, 1]} : vector<64x32xf32> to vector<8x32xf32>
    %cst_79 = arith.constant dense<0.000000e+00> : vector<8x32xf32>
    %83 = tpu.matmul %81, %69, %cst_79 {dimension_numbers = #tpu.dot_dimension_numbers<[1], [0], [0], [1], [0, 0, 1, 1], [], []>} : vector<8x32xf32>, vector<32x32xf32>, vector<8x32xf32> -> vector<8x32xf32>
    %84 = arith.addf %83, %73 : vector<8x32xf32>
    %cst_80 = arith.constant dense<0.000000e+00> : vector<8x32xf32>
    %85 = tpu.matmul %80, %67, %cst_80 {dimension_numbers = #tpu.dot_dimension_numbers<[1], [0], [0], [1], [0, 0, 1, 1], [], []>} : vector<8x32xf32>, vector<32x32xf32>, vector<8x32xf32> -> vector<8x32xf32>
    %86 = arith.addf %82, %85 : vector<8x32xf32>
    %87 = math.tanh %86 : vector<8x32xf32>
    %cst_81 = arith.constant dense<0.000000e+00> : vector<8x32xf32>
    %88 = tpu.matmul %87, %68, %cst_81 {dimension_numbers = #tpu.dot_dimension_numbers<[1], [0], [0], [1], [0, 0, 1, 1], [], []>} : vector<8x32xf32>, vector<32x32xf32>, vector<8x32xf32> -> vector<8x32xf32>
    %89 = arith.addf %88, %84 : vector<8x32xf32>
    %90 = math.tanh %89 : vector<8x32xf32>
    %91 = vector.extract_strided_slice %79 {offsets = [8, 0], sizes = [8, 32], strides = [1, 1]} : vector<64x32xf32> to vector<8x32xf32>
    %cst_82 = arith.constant dense<0.000000e+00> : vector<8x32xf32>
    %92 = tpu.matmul %90, %69, %cst_82 {dimension_numbers = #tpu.dot_dimension_numbers<[1], [0], [0], [1], [0, 0, 1, 1], [], []>} : vector<8x32xf32>, vector<32x32xf32>, vector<8x32xf32> -> vector<8x32xf32>
    %93 = arith.addf %92, %73 : vector<8x32xf32>
    %cst_83 = arith.constant dense<0.000000e+00> : vector<8x32xf32>
    %94 = tpu.matmul %87, %67, %cst_83 {dimension_numbers = #tpu.dot_dimension_numbers<[1], [0], [0], [1], [0, 0, 1, 1], [], []>} : vector<8x32xf32>, vector<32x32xf32>, vector<8x32xf32> -> vector<8x32xf32>
    %95 = arith.addf %91, %94 : vector<8x32xf32>
    %96 = math.tanh %95 : vector<8x32xf32>
    %cst_84 = arith.constant dense<0.000000e+00> : vector<8x32xf32>
    %97 = tpu.matmul %96, %68, %cst_84 {dimension_numbers = #tpu.dot_dimension_numbers<[1], [0], [0], [1], [0, 0, 1, 1], [], []>} : vector<8x32xf32>, vector<32x32xf32>, vector<8x32xf32> -> vector<8x32xf32>
    %98 = arith.addf %97, %93 : vector<8x32xf32>
    %99 = math.tanh %98 : vector<8x32xf32>
    %100 = vector.extract_strided_slice %79 {offsets = [16, 0], sizes = [8, 32], strides = [1, 1]} : vector<64x32xf32> to vector<8x32xf32>
    %cst_85 = arith.constant dense<0.000000e+00> : vector<8x32xf32>
    %101 = tpu.matmul %99, %69, %cst_85 {dimension_numbers = #tpu.dot_dimension_numbers<[1], [0], [0], [1], [0, 0, 1, 1], [], []>} : vector<8x32xf32>, vector<32x32xf32>, vector<8x32xf32> -> vector<8x32xf32>
    %102 = arith.addf %101, %73 : vector<8x32xf32>
    %cst_86 = arith.constant dense<0.000000e+00> : vector<8x32xf32>
    %103 = tpu.matmul %96, %67, %cst_86 {dimension_numbers = #tpu.dot_dimension_numbers<[1], [0], [0], [1], [0, 0, 1, 1], [], []>} : vector<8x32xf32>, vector<32x32xf32>, vector<8x32xf32> -> vector<8x32xf32>
    %104 = arith.addf %100, %103 : vector<8x32xf32>
    %105 = math.tanh %104 : vector<8x32xf32>
    %cst_87 = arith.constant dense<0.000000e+00> : vector<8x32xf32>
    %106 = tpu.matmul %105, %68, %cst_87 {dimension_numbers = #tpu.dot_dimension_numbers<[1], [0], [0], [1], [0, 0, 1, 1], [], []>} : vector<8x32xf32>, vector<32x32xf32>, vector<8x32xf32> -> vector<8x32xf32>
    %107 = arith.addf %106, %102 : vector<8x32xf32>
    %108 = math.tanh %107 : vector<8x32xf32>
    %109 = vector.extract_strided_slice %79 {offsets = [24, 0], sizes = [8, 32], strides = [1, 1]} : vector<64x32xf32> to vector<8x32xf32>
    %cst_88 = arith.constant dense<0.000000e+00> : vector<8x32xf32>
    %110 = tpu.matmul %108, %69, %cst_88 {dimension_numbers = #tpu.dot_dimension_numbers<[1], [0], [0], [1], [0, 0, 1, 1], [], []>} : vector<8x32xf32>, vector<32x32xf32>, vector<8x32xf32> -> vector<8x32xf32>
    %111 = arith.addf %110, %73 : vector<8x32xf32>
    %cst_89 = arith.constant dense<0.000000e+00> : vector<8x32xf32>
    %112 = tpu.matmul %105, %67, %cst_89 {dimension_numbers = #tpu.dot_dimension_numbers<[1], [0], [0], [1], [0, 0, 1, 1], [], []>} : vector<8x32xf32>, vector<32x32xf32>, vector<8x32xf32> -> vector<8x32xf32>
    %113 = arith.addf %109, %112 : vector<8x32xf32>
    %114 = math.tanh %113 : vector<8x32xf32>
    %cst_90 = arith.constant dense<0.000000e+00> : vector<8x32xf32>
    %115 = tpu.matmul %114, %68, %cst_90 {dimension_numbers = #tpu.dot_dimension_numbers<[1], [0], [0], [1], [0, 0, 1, 1], [], []>} : vector<8x32xf32>, vector<32x32xf32>, vector<8x32xf32> -> vector<8x32xf32>
    %116 = arith.addf %115, %111 : vector<8x32xf32>
    %117 = math.tanh %116 : vector<8x32xf32>
    %118 = vector.extract_strided_slice %79 {offsets = [32, 0], sizes = [8, 32], strides = [1, 1]} : vector<64x32xf32> to vector<8x32xf32>
    %cst_91 = arith.constant dense<0.000000e+00> : vector<8x32xf32>
    %119 = tpu.matmul %117, %69, %cst_91 {dimension_numbers = #tpu.dot_dimension_numbers<[1], [0], [0], [1], [0, 0, 1, 1], [], []>} : vector<8x32xf32>, vector<32x32xf32>, vector<8x32xf32> -> vector<8x32xf32>
    %120 = arith.addf %119, %73 : vector<8x32xf32>
    %cst_92 = arith.constant dense<0.000000e+00> : vector<8x32xf32>
    %121 = tpu.matmul %114, %67, %cst_92 {dimension_numbers = #tpu.dot_dimension_numbers<[1], [0], [0], [1], [0, 0, 1, 1], [], []>} : vector<8x32xf32>, vector<32x32xf32>, vector<8x32xf32> -> vector<8x32xf32>
    %122 = arith.addf %118, %121 : vector<8x32xf32>
    %123 = math.tanh %122 : vector<8x32xf32>
    %cst_93 = arith.constant dense<0.000000e+00> : vector<8x32xf32>
    %124 = tpu.matmul %123, %68, %cst_93 {dimension_numbers = #tpu.dot_dimension_numbers<[1], [0], [0], [1], [0, 0, 1, 1], [], []>} : vector<8x32xf32>, vector<32x32xf32>, vector<8x32xf32> -> vector<8x32xf32>
    %125 = arith.addf %124, %120 : vector<8x32xf32>
    %126 = math.tanh %125 : vector<8x32xf32>
    %127 = vector.extract_strided_slice %79 {offsets = [40, 0], sizes = [8, 32], strides = [1, 1]} : vector<64x32xf32> to vector<8x32xf32>
    %cst_94 = arith.constant dense<0.000000e+00> : vector<8x32xf32>
    %128 = tpu.matmul %126, %69, %cst_94 {dimension_numbers = #tpu.dot_dimension_numbers<[1], [0], [0], [1], [0, 0, 1, 1], [], []>} : vector<8x32xf32>, vector<32x32xf32>, vector<8x32xf32> -> vector<8x32xf32>
    %129 = arith.addf %128, %73 : vector<8x32xf32>
    %cst_95 = arith.constant dense<0.000000e+00> : vector<8x32xf32>
    %130 = tpu.matmul %123, %67, %cst_95 {dimension_numbers = #tpu.dot_dimension_numbers<[1], [0], [0], [1], [0, 0, 1, 1], [], []>} : vector<8x32xf32>, vector<32x32xf32>, vector<8x32xf32> -> vector<8x32xf32>
    %131 = arith.addf %127, %130 : vector<8x32xf32>
    %132 = math.tanh %131 : vector<8x32xf32>
    %cst_96 = arith.constant dense<0.000000e+00> : vector<8x32xf32>
    %133 = tpu.matmul %132, %68, %cst_96 {dimension_numbers = #tpu.dot_dimension_numbers<[1], [0], [0], [1], [0, 0, 1, 1], [], []>} : vector<8x32xf32>, vector<32x32xf32>, vector<8x32xf32> -> vector<8x32xf32>
    %134 = arith.addf %133, %129 : vector<8x32xf32>
    %135 = math.tanh %134 : vector<8x32xf32>
    %136 = vector.extract_strided_slice %79 {offsets = [48, 0], sizes = [8, 32], strides = [1, 1]} : vector<64x32xf32> to vector<8x32xf32>
    %cst_97 = arith.constant dense<0.000000e+00> : vector<8x32xf32>
    %137 = tpu.matmul %135, %69, %cst_97 {dimension_numbers = #tpu.dot_dimension_numbers<[1], [0], [0], [1], [0, 0, 1, 1], [], []>} : vector<8x32xf32>, vector<32x32xf32>, vector<8x32xf32> -> vector<8x32xf32>
    %138 = arith.addf %137, %73 : vector<8x32xf32>
    %cst_98 = arith.constant dense<0.000000e+00> : vector<8x32xf32>
    %139 = tpu.matmul %132, %67, %cst_98 {dimension_numbers = #tpu.dot_dimension_numbers<[1], [0], [0], [1], [0, 0, 1, 1], [], []>} : vector<8x32xf32>, vector<32x32xf32>, vector<8x32xf32> -> vector<8x32xf32>
    %140 = arith.addf %136, %139 : vector<8x32xf32>
    %141 = math.tanh %140 : vector<8x32xf32>
    %cst_99 = arith.constant dense<0.000000e+00> : vector<8x32xf32>
    %142 = tpu.matmul %141, %68, %cst_99 {dimension_numbers = #tpu.dot_dimension_numbers<[1], [0], [0], [1], [0, 0, 1, 1], [], []>} : vector<8x32xf32>, vector<32x32xf32>, vector<8x32xf32> -> vector<8x32xf32>
    %143 = arith.addf %142, %138 : vector<8x32xf32>
    %144 = math.tanh %143 : vector<8x32xf32>
    %145 = vector.extract_strided_slice %79 {offsets = [56, 0], sizes = [8, 32], strides = [1, 1]} : vector<64x32xf32> to vector<8x32xf32>
    %cst_100 = arith.constant dense<0.000000e+00> : vector<8x32xf32>
    %146 = tpu.matmul %144, %69, %cst_100 {dimension_numbers = #tpu.dot_dimension_numbers<[1], [0], [0], [1], [0, 0, 1, 1], [], []>} : vector<8x32xf32>, vector<32x32xf32>, vector<8x32xf32> -> vector<8x32xf32>
    %147 = arith.addf %146, %73 : vector<8x32xf32>
    %cst_101 = arith.constant dense<0.000000e+00> : vector<8x32xf32>
    %148 = tpu.matmul %141, %67, %cst_101 {dimension_numbers = #tpu.dot_dimension_numbers<[1], [0], [0], [1], [0, 0, 1, 1], [], []>} : vector<8x32xf32>, vector<32x32xf32>, vector<8x32xf32> -> vector<8x32xf32>
    %149 = arith.addf %145, %148 : vector<8x32xf32>
    %150 = math.tanh %149 : vector<8x32xf32>
    %cst_102 = arith.constant dense<0.000000e+00> : vector<8x32xf32>
    %151 = tpu.matmul %150, %68, %cst_102 {dimension_numbers = #tpu.dot_dimension_numbers<[1], [0], [0], [1], [0, 0, 1, 1], [], []>} : vector<8x32xf32>, vector<32x32xf32>, vector<8x32xf32> -> vector<8x32xf32>
    %152 = arith.addf %151, %147 : vector<8x32xf32>
    %153 = math.tanh %152 : vector<8x32xf32>
    %c0_103 = arith.constant 0 : index
    %c0_104 = arith.constant 0 : index
    %154 = vector.load %arg3[%c0_103, %c0_104] : memref<160x128xf32, #tpu.memory_space<vmem>>, vector<32x128xf32>
    %cst_105 = arith.constant dense<0.000000e+00> : vector<8x128xf32>
    %155 = tpu.matmul %153, %154, %cst_105 {dimension_numbers = #tpu.dot_dimension_numbers<[1], [0], [0], [1], [0, 0, 1, 1], [], []>} : vector<8x32xf32>, vector<32x128xf32>, vector<8x128xf32> -> vector<8x128xf32>
    %156 = vector.broadcast %74 : vector<1x128xf32> to vector<8x128xf32>
    %157 = arith.addf %155, %156 : vector<8x128xf32>
    %cst_106 = arith.constant 0.000000e+00 : f32
    %158 = vector.broadcast %cst_106 : f32 to vector<8x128xf32>
    %159 = arith.maximumf %157, %158 : vector<8x128xf32>
    %c32_107 = arith.constant 32 : index
    %c0_108 = arith.constant 0 : index
    %160 = vector.load %arg3[%c32_107, %c0_108] : memref<160x128xf32, #tpu.memory_space<vmem>>, vector<128x128xf32>
    %cst_109 = arith.constant dense<0.000000e+00> : vector<8x128xf32>
    %161 = tpu.matmul %159, %160, %cst_109 {dimension_numbers = #tpu.dot_dimension_numbers<[1], [0], [0], [1], [0, 0, 1, 1], [], []>} : vector<8x128xf32>, vector<128x128xf32>, vector<8x128xf32> -> vector<8x128xf32>
    %162 = vector.broadcast %75 : vector<1x128xf32> to vector<8x128xf32>
    %163 = arith.addf %161, %162 : vector<8x128xf32>
    %c0_110 = arith.constant 0 : index
    %c0_111 = arith.constant 0 : index
    %164 = vector.load %arg5[%c0_110, %c0_111] : memref<8x128xf32, #tpu.memory_space<vmem>>, vector<8x128xf32>
    tpu.vector_store %arg5[%c0_110, %c0_111], %163 {strides = array<i32>} : memref<8x128xf32, #tpu.memory_space<vmem>>, vector<8x128xf32>,
    return
  }
}

</mosaic_0001>

<bundles_post_ra>
// kernel: textrnn_forward.1
= control target key start
LH: loop header
LB: loop body
LE: loop exit
PB: predicated region body
PF: predicated region fallthrough
CT: control target
= control target key end

     0   :  { %10 = vsyncpa [#allocation4], 0  ;;  %s3417_s0 = inlined_call_operand.vmem [shape: s32[2,8], index: 0, kind: input, shape index: {}]   ;;  %s3418_s1 = inlined_call_operand.vmem [shape: f32[50,32], index: 1, kind: input, shape index: {}]   ;;  %s3419_s2 = inlined_call_operand.vmem [shape: f32[128,32], index: 2, kind: input, shape index: {}]   ;;  %s3420_s3 = inlined_call_operand.vmem [shape: f32[160,128], index: 3, kind: input, shape index: {}]   ;;  %s3421_s4 = inlined_call_operand.vmem [shape: f32[8,128], index: 4, kind: input, shape index: {}]   ;;  %s3422_s5 = inlined_call_operand.vmem [shape: f32[8,128], index: 5, kind: output, shape index: {}]  }
   0x1   :  { %s17_s20 = sshll.u32 %s3417_s0, 4  ;;  %s18_s20 = int_to_ptr.vmem [resolvable:$true] %s17_s20 }
   0x2   :  { %s2787_s21 = scalar_lea.vmem %s18_s20, 32  ;;  %p2792_p1 = scmp.lt.s32.totalorder %s18_s20, %s18_s20 }
   0x3   :  { %p2788_p0 = scmp.ne.s32.totalorder %s18_s20, %s2787_s21  ;;  %p2793_p2 = scmp.lt.s32.totalorder %s2787_s21, %s2787_s21 }
   0x5   :  { %p2794_p3 = por %p2793_p2, %p2792_p1 }
   0x7   :  { %p2795_p4 = pnand %p2794_p3, %p2788_p0 }
   0x9   :  { %2798 = shalt.err (!%p2795_p4)
}
   0xa   :  { %s2801_s22 = smov [#allocation3]  }
   0xb   :  { %20 = dma.vmem_to_smem %s18_s20, 32, %s2801_s22, [#allocation4]  }
   0xc   :  { %2799 = dma.done.wait [#allocation4], 32  }
   0xd   :  { %2800 = vsyncadd [#allocation4], 4294967264 }
   0xe   :  { %32 = sfence }
   0xf   :  { %v110_v0 = vld [vmem:[%s3419_s2 + $0x18] sm:$0xff]  ;;  %v109_v1 = vld [vmem:[%s3419_s2 + $0x10] sm:$0xff]  ;;  %vm33_vm0 = vcmask 261120   ;;  %v2802_v3 = vmov 0.0   ;;  %s2856_s30 = sld [smem:[#allocation3]]  ;;  %v108_v5 = vld [vmem:[%s3419_s2 + $0x8] sm:$0xff] }
  0x10   :  { %v2846_v2 = vld [vmem:[%s3419_s2 + $0x38] sm:$0xff]  ;;  %2422 = vmatprep.subr.mxu0 %v110_v0  ;;  %2453 = vmatprep.subr.mxu1 %v2802_v3  ;;  %v2852_v4 = vld [vmem:[%s3419_s2 + $0x30] sm:$0xff]  ;;  %34 = vst.msk [vmem:[#allocation2] sm:$0xff] %vm33_vm0, %v2802_v3  ;;  %35 = vst.msk [vmem:[#allocation2 + $0x8] sm:$0xff] %vm33_vm0, %v2802_v3  ;;  %s2218_s8 = sld [smem:[#allocation3 + $0x80]]  ;;  %vm45_vm1 = vcmask 253952  }
  0x11   :  { %36 = vst.msk [vmem:[#allocation2 + $0x10] sm:$0xff] %vm33_vm0, %v2802_v3  ;;  %37 = vst.msk [vmem:[#allocation2 + $0x18] sm:$0xff] %vm33_vm0, %v2802_v3  ;;  %2423 = vmatpush3.msra.mxu0 %v110_v0  ;;  %2454 = vmatpush3.msra.mxu1 %v2846_v2  ;;  %v2880_v6 = vld [vmem:[%s3419_s2 + $0x28] sm:$0xff]  ;;  %s2882_s11 = sld [smem:[#allocation3 + $0x1]]  ;;  %v107_v7 = vld [vmem:[%s3419_s2] sm:$0xff]  ;;  %vm2803_vm2 = vmmov 0  }
  0x12   :  { %38 = vst.msk [vmem:[#allocation2 + $0x20] sm:$0xff] %vm33_vm0, %v2802_v3  ;;  %39 = vst.msk [vmem:[#allocation2 + $0x28] sm:$0xff] %vm33_vm0, %v2802_v3  ;;  %2424 = vmatprep.subr.mxu0 %v109_v1  ;;  %2455 = vmatprep.subr.mxu1 %v2802_v3  ;;  %s2888_s14 = sld [smem:[#allocation3 + $0x81]]  ;;  %v2894_v8 = vld [vmem:[%s3419_s2 + $0x20] sm:$0xff]  ;;  %v2931_v12 = vld [vmem:[%s3419_s2 + $0x78] sm:$0xff] }
  0x13   :  { %40 = vst.msk [vmem:[#allocation2 + $0x30] sm:$0xff] %vm33_vm0, %v2802_v3  ;;  %41 = vst.msk [vmem:[#allocation2 + $0x38] sm:$0xff] %vm33_vm0, %v2802_v3  ;;  %2425 = vmatpush3.msra.mxu0 %v109_v1  ;;  %2456 = vmatpush3.msra.mxu1 %v2852_v4  ;;  %s2896_s17 = sld [smem:[#allocation3 + $0x2]]  ;;  %v3000_v30 = vld [vmem:[%s3419_s2 + $0x70] sm:$0xff]  ;;  %v3012_v34 = vld [vmem:[%s3419_s2 + $0x68] sm:$0xff] }
  0x14   :  { %2426 = vmatprep.subr.mxu0 %v108_v5  ;;  %2457 = vmatprep.subr.mxu1 %v2802_v3  ;;  %s2899_s18 = sld [smem:[#allocation3 + $0x82]]  ;;  %v3018_v35 = vld [vmem:[%s3419_s2 + $0x60] sm:$0xff]  ;;  %v3031_v37 = vld [vmem:[%s3419_s2 + $0x58] sm:$0xff]  ;;  %v3039_v38 = vld [vmem:[%s3419_s2 + $0x50] sm:$0xff] }
  0x15   :  { %2427 = vmatpush3.msra.mxu0 %v108_v5  ;;  %2458 = vmatpush3.msra.mxu1 %v2880_v6  ;;  %s43_s21 = scalar_lea.vmem %s3418_s1, %s2856_s30  ;;  %s2906_s22 = sld [smem:[#allocation3 + $0x3]]  ;;  %v3049_v39 = vld [vmem:[%s3419_s2 + $0x48] sm:$0xff]  ;;  %v3056_v40 = vld [vmem:[%s3419_s2 + $0x40] sm:$0xff] }
  0x16   :  { %2428 = vmatprep.subr.mxu0 %v107_v7  ;;  %2459 = vmatprep.subr.mxu1 %v2802_v3  ;;  %v44_v9 = vld [vmem:[%s43_s21] sm:$0x1]  ;;  %s48_s25 = scalar_lea.vmem %s3418_s1, %s2218_s8  ;;  %s2912_s26 = sld [smem:[#allocation3 + $0x83]]  ;;  %v3103_v57 = vld [vmem:[%s3421_s4 + $0x1] ss:$0 sm:$0xff] }
  0x17   :  { %2429 = vmatpush3.msra.mxu0 %v107_v7  ;;  %2460 = vmatpush3.msra.mxu1 %v2894_v8  ;;  %46 = vst.msk [vmem:[#allocation2] sm:$0x1] %vm45_vm1, %v44_v9  ;;  %v49_v10 = vld [vmem:[%s48_s25] sm:$0x1]  ;;  %s52_s28 = scalar_lea.vmem %s3418_s1, %s2882_s11  ;;  %s2227_s23 = sld [smem:[#allocation3 + $0x5]] }
  0x18   :  { %2461 = vmatprep.mubr.msk.f32.mxu1 %vm2803_vm2, %v2802_v3  ;;  %2442 = vmatprep.subr.mxu0 %v2802_v3  ;;  %50 = vst.msk [vmem:[#allocation2 + $0x1] sm:$0x1] %vm45_vm1, %v49_v10  ;;  %v53_v11 = vld [vmem:[%s52_s28] sm:$0x1]  ;;  %s56_s6 = scalar_lea.vmem %s3418_s1, %s2888_s14  ;;  %s2228_s24 = sld [smem:[#allocation3 + $0x85]] }
  0x19   :  { %2462 = vmatmul.mubr.f32.vlgmr.msra.gmra.mxu1 %v2802_v3  ;;  %2475 = vmatprep.subr.mxu1 %v2802_v3  ;;  %54 = vst.msk [vmem:[#allocation2 + $0x8] sm:$0x1] %vm45_vm1, %v53_v11  ;;  %v57_v13 = vld [vmem:[%s56_s6] sm:$0x1]  ;;  %s60_s11 = scalar_lea.vmem %s3418_s1, %s2896_s17  ;;  %s2229_s25 = sld [smem:[#allocation3 + $0x6]] }
  0x1a   :  { %2476 = vmatpush3.msra.mxu1 %v2931_v12  ;;  %2483 = vmatprep.mubr.msk.f32.mxu1 %vm2803_vm2, %v2802_v3  ;;  %58 = vst.msk [vmem:[#allocation2 + $0x9] sm:$0x1] %vm45_vm1, %v57_v13  ;;  %v61_v14 = vld [vmem:[%s60_s11] sm:$0x1]  ;;  %s64_s14 = scalar_lea.vmem %s3418_s1, %s2899_s18  ;;  %s2225_s18 = sld [smem:[#allocation3 + $0x4]] }
  0x1b   :  { %2477 = vmatprep.subr.mxu1 %v2802_v3  ;;  %62 = vst.msk [vmem:[#allocation2 + $0x10] sm:$0x1] %vm45_vm1, %v61_v14  ;;  %v65_v15 = vld [vmem:[%s64_s14] sm:$0x1]  ;;  %s68_s17 = scalar_lea.vmem %s3418_s1, %s2906_s22  ;;  %s2226_s22 = sld [smem:[#allocation3 + $0x84]] }
  0x1c   :  { %66 = vst.msk [vmem:[#allocation2 + $0x11] sm:$0x1] %vm45_vm1, %v65_v15  ;;  %v69_v16 = vld [vmem:[%s68_s17] sm:$0x1]  ;;  %s72_s21 = scalar_lea.vmem %s3418_s1, %s2912_s26  ;;  %s2230_s26 = sld [smem:[#allocation3 + $0x86]]  ;;  %2478 = vmatpush3.msra.mxu1 %v3000_v30 }
  0x1d   :  { %70 = vst.msk [vmem:[#allocation2 + $0x18] sm:$0x1] %vm45_vm1, %v69_v16  ;;  %v73_v17 = vld [vmem:[%s72_s21] sm:$0x1]  ;;  %s2231_s29 = sld [smem:[#allocation3 + $0x7]]  ;;  %s84_s11 = scalar_lea.vmem %s3418_s1, %s2227_s23  ;;  %2479 = vmatprep.subr.mxu1 %v2802_v3 }
  0x1e   :  { %74 = vst.msk [vmem:[#allocation2 + $0x19] sm:$0x1] %vm45_vm1, %v73_v17  ;;  %s2232_s8 = sld [smem:[#allocation3 + $0x87]]  ;;  %v85_v24 = vld [vmem:[%s84_s11] sm:$0x1]  ;;  %s88_s14 = scalar_lea.vmem %s3418_s1, %s2228_s24  ;;  %2480 = vmatpush3.msra.mxu1 %v3012_v34 }
  0x1f   :  { %v131_v18 = vld [vmem:[#allocation2] sm:$0xff]  ;;  %86 = vst.msk [vmem:[#allocation2 + $0x28] sm:$0x1] %vm45_vm1, %v85_v24  ;;  %s92_s17 = scalar_lea.vmem %s3418_s1, %s2229_s25  ;;  %2481 = vmatprep.subr.mxu1 %v2802_v3 }
  0x20   :  { %2430 = vmatprep.mubr.msk.f32.mxu0 %vm33_vm0, %v131_v18  ;;  %s76_s28 = scalar_lea.vmem %s3418_s1, %s2225_s18  ;;  %v89_v25 = vld [vmem:[%s88_s14] sm:$0x1]  ;;  %2482 = vmatpush3.msra.mxu1 %v3018_v35 }
  0x21   :  { %v132_v19 = vld [vmem:[#allocation2 + $0x8] sm:$0xff]  ;;  %v77_v22 = vld [vmem:[%s76_s28] sm:$0x1]  ;;  %s80_s7 = scalar_lea.vmem %s3418_s1, %s2226_s22  ;;  %90 = vst.msk [vmem:[#allocation2 + $0x29] sm:$0x1] %vm45_vm1, %v89_v25  ;;  %2497 = vmatprep.subr.mxu1 %v2802_v3 }
  0x22   :  { %2431 = vmatmul.mubr.msk.f32.vlgmr.msra.gmra.mxu0 %vm33_vm0, %v132_v19  ;;  %78 = vst.msk [vmem:[#allocation2 + $0x20] sm:$0x1] %vm45_vm1, %v77_v22  ;;  %v81_v23 = vld [vmem:[%s80_s7] sm:$0x1]  ;;  %s96_s21 = scalar_lea.vmem %s3418_s1, %s2230_s26 }
  0x23   :  { %2443 = vmatpush3.msra.mxu0 %v2931_v12  ;;  %v133_v20 = vld [vmem:[#allocation2 + $0x10] sm:$0xff]  ;;  %82 = vst.msk [vmem:[#allocation2 + $0x21] sm:$0x1] %vm45_vm1, %v81_v23  ;;  %v93_v26 = vld [vmem:[%s92_s17] sm:$0x1]  ;;  %s100_s23 = scalar_lea.vmem %s3418_s1, %s2231_s29 }
  0x24   :  { %2433 = vmatprep.mubr.msk.f32.mxu0 %vm33_vm0, %v133_v20  ;;  %2444 = vmatprep.subr.mxu0 %v2802_v3  ;;  %94 = vst.msk [vmem:[#allocation2 + $0x30] sm:$0x1] %vm45_vm1, %v93_v26  ;;  %v97_v27 = vld [vmem:[%s96_s21] sm:$0x1]  ;;  %s104_s25 = scalar_lea.vmem %s3418_s1, %s2232_s8 }
  0x25   :  { %v134_v21 = vld [vmem:[#allocation2 + $0x18] sm:$0xff]  ;;  %98 = vst.msk [vmem:[#allocation2 + $0x31] sm:$0x1] %vm45_vm1, %v97_v27  ;;  %v101_v28 = vld [vmem:[%s100_s23] sm:$0x1]  ;;  %2445 = vmatpush3.msra.mxu0 %v3000_v30 }
  0x26   :  { %2434 = vmatmul.mubr.msk.f32.gmra.mxu0 %vm33_vm0, %v134_v21  ;;  %102 = vst.msk [vmem:[#allocation2 + $0x38] sm:$0x1] %vm45_vm1, %v101_v28  ;;  %v105_v29 = vld [vmem:[%s104_s25] sm:$0x1]  ;;  %2446 = vmatprep.subr.mxu0 %v2802_v3 }
  0x27   :  { %106 = vst.msk [vmem:[#allocation2 + $0x39] sm:$0x1] %vm45_vm1, %v105_v29  ;;  %2447 = vmatpush3.msra.mxu0 %v3012_v34  ;;  %v3065_v44 = vld [vmem:[%s3421_s4] ss:$0 sm:$0xff] }
  0x28   :  { %v136_v32 = vld [vmem:[#allocation2 + $0x28] sm:$0xff]  ;;  %2448 = vmatprep.subr.mxu0 %v2802_v3 }
  0x29   :  { %2449 = vmatpush3.msra.mxu0 %v3018_v35 }
  0x2a   :  { %v135_v31 = vld [vmem:[#allocation2 + $0x20] sm:$0xff]  ;;  %2464 = vmatprep.subr.mxu0 %v2802_v3 }
  0x2b   :  { %2436 = vmatprep.mubr.msk.f32.mxu0 %vm33_vm0, %v135_v31 }
  0x2c   :  { %2437 = vmatmul.mubr.msk.f32.gmra.mxu0 %vm33_vm0, %v136_v32  ;;  %v137_v33 = vld [vmem:[#allocation2 + $0x30] sm:$0xff] }
  0x2d   :  { %2439 = vmatprep.mubr.msk.f32.mxu0 %vm33_vm0, %v137_v33 }
  0x2e   :  { %v138_v36 = vld [vmem:[#allocation2 + $0x38] sm:$0xff] }
  0x30   :  { %2440 = vmatmul.mubr.msk.f32.gmra.mxu0 %vm33_vm0, %v138_v36 }
  0x31   :  { %2450 = vmatprep.mubr.msk.f32.mxu0 %vm2803_vm2, %v2802_v3 }
  0x34   :  { %2451 = vmatmul.mubr.f32.vlgmr.msra.gmra.mxu0 %v2802_v3 }
  0x35   :  { %2465 = vmatpush3.msra.mxu0 %v3031_v37  ;;  %2472 = vmatprep.mubr.msk.f32.mxu0 %vm2803_vm2, %v2802_v3 }
  0x36   :  { %2466 = vmatprep.subr.mxu0 %v2802_v3 }
  0x37   :  { %2467 = vmatpush3.msra.mxu0 %v3039_v38 }
  0x38   :  { %2468 = vmatprep.subr.mxu0 %v2802_v3 }
  0x39   :  { %2469 = vmatpush3.msra.mxu0 %v3049_v39 }
  0x3a   :  { %2470 = vmatprep.subr.mxu0 %v2802_v3 }
  0x3b   :  { %2471 = vmatpush3.msra.mxu0 %v3056_v40 }
  0x3c   :  { %2486 = vmatprep.subr.mxu0 %v2802_v3 }
  0xd9   :  { %v411_v41 = vpop.f32.mrf.mxu1 }
  0xdb   :  { %v2463_v42 = vpop.f32.mrf.mxu1 }
  0xe2   :  { %v2432_v43 = vpop.f32.mrf.mxu0 }
  0xe3   :  { %v239_v62 = vadd.f32 %v2432_v43, %v3065_v44 }
  0xe4   :  { %v233_v45 = vpop.f32.mrf.mxu0 }
  0xe5   :  { %v234_v46 = vadd.f32 %v3065_v44, %v233_v45 }
  0xe6   :  { %v3090_v49 = vpop.f32.mrf.mxu0 }
  0xe7   :  { %v415_v47 = vadd.f32 %v411_v41, %v234_v46  ;;  %v249_v28 = vadd.f32 %v3090_v49, %v3065_v44 }
  0xe8   :  { %v243_v50 = vpop.f32.mrf.mxu0 }
  0xe9   :  { %2755 = vtanh.f32 %v415_v47  ;;  %v244_v16 = vadd.f32 %v3065_v44, %v243_v50 }
  0xec   :  { %v3092_v51 = vpop.f32.mrf.mxu0 }
  0xee   :  { %v3094_v52 = vpop.f32.mrf.mxu0 }
  0xf0   :  { %v3096_v53 = vpop.f32.mrf.mxu0 }
  0xf2   :  { %v3098_v54 = vpop.f32.mrf.mxu0 }
  0xf4   :  { %v341_v55 = vpop.f32.mrf.mxu0 }
  0xf5   :  { %v342_v58 = vadd.f32 %v3103_v57, %v341_v55 }
  0xf6   :  { %v2756_v48 = vpop.eup %2755  ;;  %v2452_v56 = vpop.f32.mrf.mxu0 }
  0xf7   :  { %2473 = vmatmul.mubr.msk.f32.vlgmr.msra.gmra.mxu0 %vm33_vm0, %v2756_v48 }
  0xf8   :  { %2487 = vmatpush3.msra.mxu0 %v2846_v2  ;;  %2494 = vmatprep.mubr.msk.f32.mxu0 %vm2803_vm2, %v2802_v3 }
  0xf9   :  { %2488 = vmatprep.subr.mxu0 %v2802_v3 }
  0xfa   :  { %2489 = vmatpush3.msra.mxu0 %v2852_v4 }
  0xfb   :  { %2490 = vmatprep.subr.mxu0 %v2802_v3 }
  0xfc   :  { %2491 = vmatpush3.msra.mxu0 %v2880_v6 }
  0xfd   :  { %2492 = vmatprep.subr.mxu0 %v2802_v3 }
  0xfe   :  { %2493 = vmatpush3.msra.mxu0 %v2894_v8 }
  0xff   :  { %2495 = vmatmul.mubr.msk.f32.vlgmr.msra.gmra.mxu0 %vm33_vm0, %v2756_v48  ;;  %2508 = vmatprep.subr.mxu0 %v2802_v3  ;;  %v254_v48 = vadd.f32 %v3065_v44, %v3094_v52 }
 0x100   :  { %2509 = vmatpush3.msra.mxu0 %v2931_v12  ;;  %2516 = vmatprep.mubr.msk.f32.mxu0 %vm2803_vm2, %v2802_v3 }
 0x101   :  { %2510 = vmatprep.subr.mxu0 %v2802_v3 }
 0x102   :  { %2511 = vmatpush3.msra.mxu0 %v3000_v30 }
 0x103   :  { %2512 = vmatprep.subr.mxu0 %v2802_v3 }
 0x104   :  { %2513 = vmatpush3.msra.mxu0 %v3012_v34 }
 0x105   :  { %2514 = vmatprep.subr.mxu0 %v2802_v3 }
 0x106   :  { %2515 = vmatpush3.msra.mxu0 %v3018_v35 }
 0x107   :  { %2530 = vmatprep.subr.mxu0 %v2802_v3 }
 0x1b7   :  { %v486_v59 = vpop.f32.mrf.mxu0 }
 0x1b8   :  { %v487_v60 = vadd.f32 %v486_v59, %v342_v58 }
 0x1b9   :  { %v2474_v61 = vpop.f32.mrf.mxu0 }
 0x1ba   :  { %2757 = vtanh.f32 %v487_v60 }
 0x1bf   :  { %v630_v63 = vpop.f32.mrf.mxu0 }
 0x1c0   :  { %v634_v0 = vadd.f32 %v630_v63, %v239_v62 }
 0x1c1   :  { %v2496_v1 = vpop.f32.mrf.mxu0 }
 0x1c2   :  { %2759 = vtanh.f32 %v634_v0  ;;  %v259_v0 = vadd.f32 %v3092_v51, %v3065_v44 }
 0x1c7   :  { %v2758_v5 = vpop.eup %2757 }
 0x1c8   :  { %2484 = vmatmul.mubr.msk.f32.vlgmr.msra.gmra.mxu1 %vm33_vm0, %v2758_v5 }
 0x1c9   :  { %2498 = vmatpush3.msra.mxu1 %v3031_v37  ;;  %2505 = vmatprep.mubr.msk.f32.mxu1 %vm2803_vm2, %v2802_v3 }
 0x1ca   :  { %2499 = vmatprep.subr.mxu1 %v2802_v3 }
 0x1cb   :  { %2500 = vmatpush3.msra.mxu1 %v3039_v38 }
 0x1cc   :  { %2501 = vmatprep.subr.mxu1 %v2802_v3 }
 0x1cd   :  { %2502 = vmatpush3.msra.mxu1 %v3049_v39 }
 0x1ce   :  { %2503 = vmatprep.subr.mxu1 %v2802_v3 }
 0x1cf   :  { %v2760_v7 = vpop.eup %2759  ;;  %2504 = vmatpush3.msra.mxu1 %v3056_v40 }
 0x1d0   :  { %2506 = vmatmul.mubr.msk.f32.vlgmr.msra.gmra.mxu1 %vm33_vm0, %v2760_v7  ;;  %2519 = vmatprep.subr.mxu1 %v2802_v3 }
 0x1d1   :  { %2520 = vmatpush3.msra.mxu1 %v2846_v2  ;;  %2527 = vmatprep.mubr.msk.f32.mxu1 %vm2803_vm2, %v2802_v3 }
 0x1d2   :  { %2521 = vmatprep.subr.mxu1 %v2802_v3 }
 0x1d3   :  { %2522 = vmatpush3.msra.mxu1 %v2852_v4 }
 0x1d4   :  { %2523 = vmatprep.subr.mxu1 %v2802_v3 }
 0x1d5   :  { %2524 = vmatpush3.msra.mxu1 %v2880_v6 }
 0x1d6   :  { %2525 = vmatprep.subr.mxu1 %v2802_v3 }
 0x1d7   :  { %2526 = vmatpush3.msra.mxu1 %v2894_v8 }
 0x1d8   :  { %2528 = vmatmul.mubr.msk.f32.vlgmr.msra.gmra.mxu1 %vm33_vm0, %v2760_v7  ;;  %2541 = vmatprep.subr.mxu1 %v2802_v3 }
 0x1d9   :  { %2542 = vmatpush3.msra.mxu1 %v2931_v12  ;;  %2549 = vmatprep.mubr.msk.f32.mxu1 %vm2803_vm2, %v2802_v3 }
 0x1da   :  { %2543 = vmatprep.subr.mxu1 %v2802_v3 }
 0x1db   :  { %2544 = vmatpush3.msra.mxu1 %v3000_v30 }
 0x1dc   :  { %2545 = vmatprep.subr.mxu1 %v2802_v3 }
 0x1dd   :  { %2546 = vmatpush3.msra.mxu1 %v3012_v34 }
 0x1de   :  { %2547 = vmatprep.subr.mxu1 %v2802_v3 }
 0x1df   :  { %2548 = vmatpush3.msra.mxu1 %v3018_v35 }
 0x1e0   :  { %2563 = vmatprep.subr.mxu1 %v2802_v3 }
 0x288   :  { %v560_v9 = vpop.f32.mrf.mxu1 }
 0x289   :  { %v561_v11 = vadd.f32 %v3103_v57, %v560_v9 }
 0x28a   :  { %v2485_v10 = vpop.f32.mrf.mxu1 }
 0x290   :  { %v705_v13 = vpop.f32.mrf.mxu1 }
 0x291   :  { %v706_v14 = vadd.f32 %v705_v13, %v561_v11 }
 0x292   :  { %v2507_v15 = vpop.f32.mrf.mxu1 }
 0x293   :  { %2761 = vtanh.f32 %v706_v14 }
 0x298   :  { %v849_v17 = vpop.f32.mrf.mxu1 }
 0x299   :  { %v853_v18 = vadd.f32 %v849_v17, %v244_v16 }
 0x29a   :  { %v2529_v19 = vpop.f32.mrf.mxu1 }
 0x29b   :  { %2763 = vtanh.f32 %v853_v18 }
 0x2a0   :  { %v2762_v20 = vpop.eup %2761 }
 0x2a1   :  { %2517 = vmatmul.mubr.msk.f32.vlgmr.msra.gmra.mxu0 %vm33_vm0, %v2762_v20 }
 0x2a2   :  { %2531 = vmatpush3.msra.mxu0 %v3031_v37  ;;  %2538 = vmatprep.mubr.msk.f32.mxu0 %vm2803_vm2, %v2802_v3 }
 0x2a3   :  { %2532 = vmatprep.subr.mxu0 %v2802_v3 }
 0x2a4   :  { %2533 = vmatpush3.msra.mxu0 %v3039_v38 }
 0x2a5   :  { %2534 = vmatprep.subr.mxu0 %v2802_v3 }
 0x2a6   :  { %2535 = vmatpush3.msra.mxu0 %v3049_v39 }
 0x2a7   :  { %2536 = vmatprep.subr.mxu0 %v2802_v3 }
 0x2a8   :  { %v2764_v21 = vpop.eup %2763  ;;  %2537 = vmatpush3.msra.mxu0 %v3056_v40 }
 0x2a9   :  { %2552 = vmatprep.subr.mxu0 %v2802_v3  ;;  %2539 = vmatmul.mubr.msk.f32.vlgmr.msra.gmra.mxu0 %vm33_vm0, %v2764_v21 }
 0x2aa   :  { %2553 = vmatpush3.msra.mxu0 %v2846_v2  ;;  %2560 = vmatprep.mubr.msk.f32.mxu0 %vm2803_vm2, %v2802_v3 }
 0x2ab   :  { %2554 = vmatprep.subr.mxu0 %v2802_v3 }
 0x2ac   :  { %2555 = vmatpush3.msra.mxu0 %v2852_v4 }
 0x2ad   :  { %2556 = vmatprep.subr.mxu0 %v2802_v3 }
 0x2ae   :  { %2557 = vmatpush3.msra.mxu0 %v2880_v6 }
 0x2af   :  { %2558 = vmatprep.subr.mxu0 %v2802_v3 }
 0x2b0   :  { %2559 = vmatpush3.msra.mxu0 %v2894_v8 }
 0x2b1   :  { %2561 = vmatmul.mubr.msk.f32.vlgmr.msra.gmra.mxu0 %vm33_vm0, %v2764_v21  ;;  %2574 = vmatprep.subr.mxu0 %v2802_v3 }
 0x2b2   :  { %2575 = vmatpush3.msra.mxu0 %v2931_v12  ;;  %2582 = vmatprep.mubr.msk.f32.mxu0 %vm2803_vm2, %v2802_v3 }
 0x2b3   :  { %2576 = vmatprep.subr.mxu0 %v2802_v3 }
 0x2b4   :  { %2577 = vmatpush3.msra.mxu0 %v3000_v30 }
 0x2b5   :  { %2578 = vmatprep.subr.mxu0 %v2802_v3 }
 0x2b6   :  { %2579 = vmatpush3.msra.mxu0 %v3012_v34 }
 0x2b7   :  { %2580 = vmatprep.subr.mxu0 %v2802_v3 }
 0x2b8   :  { %2581 = vmatpush3.msra.mxu0 %v3018_v35 }
 0x2b9   :  { %2596 = vmatprep.subr.mxu0 %v2802_v3 }
 0x361   :  { %v779_v22 = vpop.f32.mrf.mxu0 }
 0x362   :  { %v780_v24 = vadd.f32 %v3103_v57, %v779_v22 }
 0x363   :  { %v2518_v23 = vpop.f32.mrf.mxu0 }
 0x369   :  { %v924_v25 = vpop.f32.mrf.mxu0 }
 0x36a   :  { %v925_v26 = vadd.f32 %v924_v25, %v780_v24  ;;  %v2120_v25 = vld [vmem:[%s3420_s3 + $0x90] sm:$0xff] }
 0x36b   :  { %v2540_v27 = vpop.f32.mrf.mxu0 }
 0x36c   :  { %2765 = vtanh.f32 %v925_v26  ;;  %v2119_v26 = vld [vmem:[%s3420_s3 + $0x88] sm:$0xff]  ;;  %v2118_v27 = vld [vmem:[%s3420_s3 + $0x80] sm:$0xff] }
 0x371   :  { %v1068_v29 = vpop.f32.mrf.mxu0 }
 0x372   :  { %v1072_v31 = vadd.f32 %v1068_v29, %v249_v28  ;;  %v2117_v28 = vld [vmem:[%s3420_s3 + $0x78] sm:$0xff]  ;;  %v2116_v29 = vld [vmem:[%s3420_s3 + $0x70] sm:$0xff] }
 0x373   :  { %v2562_v32 = vpop.f32.mrf.mxu0 }
 0x374   :  { %2767 = vtanh.f32 %v1072_v31  ;;  %v2115_v31 = vld [vmem:[%s3420_s3 + $0x68] sm:$0xff]  ;;  %v2114_v32 = vld [vmem:[%s3420_s3 + $0x60] sm:$0xff] }
 0x379   :  { %v2766_v33 = vpop.eup %2765 }
 0x37a   :  { %2550 = vmatmul.mubr.msk.f32.vlgmr.msra.gmra.mxu1 %vm33_vm0, %v2766_v33  ;;  %v2113_v33 = vld [vmem:[%s3420_s3 + $0x58] sm:$0xff] }
 0x37b   :  { %2564 = vmatpush3.msra.mxu1 %v3031_v37  ;;  %2571 = vmatprep.mubr.msk.f32.mxu1 %vm2803_vm2, %v2802_v3 }
 0x37c   :  { %2565 = vmatprep.subr.mxu1 %v2802_v3 }
 0x37d   :  { %2566 = vmatpush3.msra.mxu1 %v3039_v38 }
 0x37e   :  { %2567 = vmatprep.subr.mxu1 %v2802_v3 }
 0x37f   :  { %2568 = vmatpush3.msra.mxu1 %v3049_v39 }
 0x380   :  { %2569 = vmatprep.subr.mxu1 %v2802_v3 }
 0x381   :  { %v2768_v36 = vpop.eup %2767  ;;  %2570 = vmatpush3.msra.mxu1 %v3056_v40 }
 0x382   :  { %2572 = vmatmul.mubr.msk.f32.vlgmr.msra.gmra.mxu1 %vm33_vm0, %v2768_v36  ;;  %2585 = vmatprep.subr.mxu1 %v2802_v3 }
 0x383   :  { %2586 = vmatpush3.msra.mxu1 %v2846_v2  ;;  %2593 = vmatprep.mubr.msk.f32.mxu1 %vm2803_vm2, %v2802_v3 }
 0x384   :  { %2587 = vmatprep.subr.mxu1 %v2802_v3 }
 0x385   :  { %2588 = vmatpush3.msra.mxu1 %v2852_v4 }
 0x386   :  { %2589 = vmatprep.subr.mxu1 %v2802_v3 }
 0x387   :  { %2590 = vmatpush3.msra.mxu1 %v2880_v6 }
 0x388   :  { %2591 = vmatprep.subr.mxu1 %v2802_v3 }
 0x389   :  { %2592 = vmatpush3.msra.mxu1 %v2894_v8 }
 0x38a   :  { %2594 = vmatmul.mubr.msk.f32.vlgmr.msra.gmra.mxu1 %vm33_vm0, %v2768_v36  ;;  %2607 = vmatprep.subr.mxu1 %v2802_v3  ;;  %v2112_v36 = vld [vmem:[%s3420_s3 + $0x50] sm:$0xff] }
 0x38b   :  { %2608 = vmatpush3.msra.mxu1 %v2931_v12  ;;  %2615 = vmatprep.mubr.msk.f32.mxu1 %vm2803_vm2, %v2802_v3 }
 0x38c   :  { %2609 = vmatprep.subr.mxu1 %v2802_v3 }
 0x38d   :  { %2610 = vmatpush3.msra.mxu1 %v3000_v30 }
 0x38e   :  { %2611 = vmatprep.subr.mxu1 %v2802_v3 }
 0x38f   :  { %2612 = vmatpush3.msra.mxu1 %v3012_v34 }
 0x390   :  { %2613 = vmatprep.subr.mxu1 %v2802_v3 }
 0x391   :  { %2614 = vmatpush3.msra.mxu1 %v3018_v35 }
 0x392   :  { %2629 = vmatprep.subr.mxu1 %v2802_v3 }
 0x43a   :  { %v998_v41 = vpop.f32.mrf.mxu1 }
 0x43b   :  { %v999_v43 = vadd.f32 %v3103_v57, %v998_v41  ;;  %v2111_v41 = vld [vmem:[%s3420_s3 + $0x48] sm:$0xff] }
 0x43c   :  { %v2551_v42 = vpop.f32.mrf.mxu1 }
 0x43d   :  { %v2110_v42 = vld [vmem:[%s3420_s3 + $0x40] sm:$0xff] }
 0x442   :  { %v1143_v45 = vpop.f32.mrf.mxu1 }
 0x443   :  { %v1144_v46 = vadd.f32 %v1143_v45, %v999_v43  ;;  %v2109_v43 = vld [vmem:[%s3420_s3 + $0x38] sm:$0xff] }
 0x444   :  { %v2573_v47 = vpop.f32.mrf.mxu1 }
 0x445   :  { %2769 = vtanh.f32 %v1144_v46 }
 0x44a   :  { %v1287_v49 = vpop.f32.mrf.mxu1 }
 0x44b   :  { %v1291_v50 = vadd.f32 %v1287_v49, %v254_v48 }
 0x44c   :  { %v2595_v55 = vpop.f32.mrf.mxu1 }
 0x44d   :  { %2771 = vtanh.f32 %v1291_v50 }
 0x452   :  { %v2770_v56 = vpop.eup %2769 }
 0x453   :  { %2583 = vmatmul.mubr.msk.f32.vlgmr.msra.gmra.mxu0 %vm33_vm0, %v2770_v56  ;;  %v2108_v56 = vld [vmem:[%s3420_s3 + $0x30] sm:$0xff] }
 0x454   :  { %2597 = vmatpush3.msra.mxu0 %v3031_v37  ;;  %2604 = vmatprep.mubr.msk.f32.mxu0 %vm2803_vm2, %v2802_v3 }
 0x455   :  { %2598 = vmatprep.subr.mxu0 %v2802_v3 }
 0x456   :  { %2599 = vmatpush3.msra.mxu0 %v3039_v38 }
 0x457   :  { %2600 = vmatprep.subr.mxu0 %v2802_v3 }
 0x458   :  { %2601 = vmatpush3.msra.mxu0 %v3049_v39 }
 0x459   :  { %2602 = vmatprep.subr.mxu0 %v2802_v3 }
 0x45a   :  { %v2772_v52 = vpop.eup %2771  ;;  %2603 = vmatpush3.msra.mxu0 %v3056_v40 }
 0x45b   :  { %2618 = vmatprep.subr.mxu0 %v2802_v3  ;;  %2605 = vmatmul.mubr.msk.f32.vlgmr.msra.gmra.mxu0 %vm33_vm0, %v2772_v52 }
 0x45c   :  { %2619 = vmatpush3.msra.mxu0 %v2846_v2  ;;  %2626 = vmatprep.mubr.msk.f32.mxu0 %vm2803_vm2, %v2802_v3 }
 0x45d   :  { %2620 = vmatprep.subr.mxu0 %v2802_v3 }
 0x45e   :  { %2621 = vmatpush3.msra.mxu0 %v2852_v4 }
 0x45f   :  { %2622 = vmatprep.subr.mxu0 %v2802_v3 }
 0x460   :  { %2623 = vmatpush3.msra.mxu0 %v2880_v6 }
 0x461   :  { %2624 = vmatprep.subr.mxu0 %v2802_v3 }
 0x462   :  { %2625 = vmatpush3.msra.mxu0 %v2894_v8 }
 0x463   :  { %2627 = vmatmul.mubr.msk.f32.vlgmr.msra.gmra.mxu0 %vm33_vm0, %v2772_v52  ;;  %2640 = vmatprep.subr.mxu0 %v2802_v3  ;;  %v2107_v52 = vld [vmem:[%s3420_s3 + $0x28] sm:$0xff] }
 0x464   :  { %2641 = vmatpush3.msra.mxu0 %v2931_v12  ;;  %2648 = vmatprep.mubr.msk.f32.mxu0 %vm2803_vm2, %v2802_v3 }
 0x465   :  { %2642 = vmatprep.subr.mxu0 %v2802_v3 }
 0x466   :  { %2643 = vmatpush3.msra.mxu0 %v3000_v30 }
 0x467   :  { %2644 = vmatprep.subr.mxu0 %v2802_v3 }
 0x468   :  { %2645 = vmatpush3.msra.mxu0 %v3012_v34 }
 0x469   :  { %2646 = vmatprep.subr.mxu0 %v2802_v3 }
 0x46a   :  { %2647 = vmatpush3.msra.mxu0 %v3018_v35 }
 0x46b   :  { %2662 = vmatprep.subr.mxu0 %v2802_v3 }
 0x513   :  { %v1217_v58 = vpop.f32.mrf.mxu0 }
 0x514   :  { %v1218_v60 = vadd.f32 %v3103_v57, %v1217_v58  ;;  %v2265_v58 = vld [vmem:[%s3421_s4 + $0x2] ss:$0 sm:$0xff] }
 0x515   :  { %v2584_v59 = vpop.f32.mrf.mxu0 }
 0x51b   :  { %v1362_v61 = vpop.f32.mrf.mxu0 }
 0x51c   :  { %v1363_v62 = vadd.f32 %v1362_v61, %v1218_v60 }
 0x51d   :  { %v2606_v63 = vpop.f32.mrf.mxu0 }
 0x51e   :  { %2773 = vtanh.f32 %v1363_v62  ;;  %v2267_v63 = vld [vmem:[%s3421_s4 + $0x3] ss:$0 sm:$0xff] }
 0x523   :  { %v1506_v1 = vpop.f32.mrf.mxu0 }
 0x524   :  { %v1510_v5 = vadd.f32 %v1506_v1, %v259_v0 }
 0x525   :  { %v2628_v7 = vpop.f32.mrf.mxu0 }
 0x526   :  { %2775 = vtanh.f32 %v1510_v5 }
 0x52b   :  { %v2774_v9 = vpop.eup %2773 }
 0x52c   :  { %2616 = vmatmul.mubr.msk.f32.vlgmr.msra.gmra.mxu1 %vm33_vm0, %v2774_v9 }
 0x52d   :  { %2630 = vmatpush3.msra.mxu1 %v3031_v37  ;;  %2637 = vmatprep.mubr.msk.f32.mxu1 %vm2803_vm2, %v2802_v3 }
 0x52e   :  { %2631 = vmatprep.subr.mxu1 %v2802_v3 }
 0x52f   :  { %2632 = vmatpush3.msra.mxu1 %v3039_v38 }
 0x530   :  { %2633 = vmatprep.subr.mxu1 %v2802_v3 }
 0x531   :  { %2634 = vmatpush3.msra.mxu1 %v3049_v39 }
 0x532   :  { %2635 = vmatprep.subr.mxu1 %v2802_v3 }
 0x533   :  { %v2776_v51 = vpop.eup %2775  ;;  %2636 = vmatpush3.msra.mxu1 %v3056_v40 }
 0x534   :  { %2638 = vmatmul.mubr.msk.f32.vlgmr.msra.gmra.mxu1 %vm33_vm0, %v2776_v51  ;;  %2651 = vmatprep.subr.mxu1 %v2802_v3 }
 0x535   :  { %2652 = vmatpush3.msra.mxu1 %v2846_v2  ;;  %2659 = vmatprep.mubr.msk.f32.mxu1 %vm2803_vm2, %v2802_v3 }
 0x536   :  { %2653 = vmatprep.subr.mxu1 %v2802_v3 }
 0x537   :  { %2654 = vmatpush3.msra.mxu1 %v2852_v4 }
 0x538   :  { %2655 = vmatprep.subr.mxu1 %v2802_v3 }
 0x539   :  { %2656 = vmatpush3.msra.mxu1 %v2880_v6 }
 0x53a   :  { %2657 = vmatprep.subr.mxu1 %v2802_v3 }
 0x53b   :  { %2658 = vmatpush3.msra.mxu1 %v2894_v8 }
 0x53c   :  { %2660 = vmatmul.mubr.msk.f32.vlgmr.msra.gmra.mxu1 %vm33_vm0, %v2776_v51  ;;  %2673 = vmatprep.subr.mxu1 %v2802_v3 }
 0x53d   :  { %2674 = vmatpush3.msra.mxu1 %v2931_v12  ;;  %2681 = vmatprep.mubr.msk.f32.mxu1 %vm2803_vm2, %v2802_v3 }
 0x53e   :  { %2675 = vmatprep.subr.mxu1 %v2802_v3 }
 0x53f   :  { %2676 = vmatpush3.msra.mxu1 %v3000_v30  ;;  %v264_v30 = vadd.f32 %v3065_v44, %v3098_v54 }
 0x540   :  { %2677 = vmatprep.subr.mxu1 %v2802_v3 }
 0x541   :  { %2678 = vmatpush3.msra.mxu1 %v3012_v34 }
 0x542   :  { %2679 = vmatprep.subr.mxu1 %v2802_v3 }
 0x543   :  { %2680 = vmatpush3.msra.mxu1 %v3018_v35 }
 0x544   :  { %2695 = vmatprep.subr.mxu1 %v2802_v3 }
 0x5ec   :  { %v1436_v10 = vpop.f32.mrf.mxu1 }
 0x5ed   :  { %v1437_v12 = vadd.f32 %v3103_v57, %v1436_v10 }
 0x5ee   :  { %v2617_v11 = vpop.f32.mrf.mxu1 }
 0x5f4   :  { %v1581_v13 = vpop.f32.mrf.mxu1 }
 0x5f5   :  { %v1582_v14 = vadd.f32 %v1581_v13, %v1437_v12 }
 0x5f6   :  { %v2639_v15 = vpop.f32.mrf.mxu1 }
 0x5f7   :  { %2777 = vtanh.f32 %v1582_v14 }
 0x5fc   :  { %v1725_v16 = vpop.f32.mrf.mxu1 }
 0x5fd   :  { %v1729_v17 = vadd.f32 %v1725_v16, %v264_v30 }
 0x5fe   :  { %v2661_v34 = vpop.f32.mrf.mxu1 }
 0x5ff   :  { %2779 = vtanh.f32 %v1729_v17 }
 0x604   :  { %v2778_v18 = vpop.eup %2777 }
 0x605   :  { %2649 = vmatmul.mubr.msk.f32.vlgmr.msra.gmra.mxu0 %vm33_vm0, %v2778_v18 }
 0x606   :  { %2663 = vmatpush3.msra.mxu0 %v3031_v37  ;;  %2670 = vmatprep.mubr.msk.f32.mxu0 %vm2803_vm2, %v2802_v3 }
 0x607   :  { %2664 = vmatprep.subr.mxu0 %v2802_v3 }
 0x608   :  { %2665 = vmatpush3.msra.mxu0 %v3039_v38 }
 0x609   :  { %2666 = vmatprep.subr.mxu0 %v2802_v3 }
 0x60a   :  { %2667 = vmatpush3.msra.mxu0 %v3049_v39 }
 0x60b   :  { %2668 = vmatprep.subr.mxu0 %v2802_v3 }
 0x60c   :  { %v2780_v35 = vpop.eup %2779  ;;  %2669 = vmatpush3.msra.mxu0 %v3056_v40 }
 0x60d   :  { %2684 = vmatprep.subr.mxu0 %v2802_v3  ;;  %2671 = vmatmul.mubr.msk.f32.vlgmr.msra.gmra.mxu0 %vm33_vm0, %v2780_v35 }
 0x60e   :  { %2685 = vmatpush3.msra.mxu0 %v2846_v2  ;;  %2692 = vmatprep.mubr.msk.f32.mxu0 %vm2803_vm2, %v2802_v3 }
 0x60f   :  { %2686 = vmatprep.subr.mxu0 %v2802_v3 }
 0x610   :  { %2687 = vmatpush3.msra.mxu0 %v2852_v4 }
 0x611   :  { %2688 = vmatprep.subr.mxu0 %v2802_v3 }
 0x612   :  { %2689 = vmatpush3.msra.mxu0 %v2880_v6  ;;  %v269_v6 = vadd.f32 %v3096_v53, %v3065_v44  ;;  %v2121_v53 = vld [vmem:[%s3420_s3 + $0x98] sm:$0xff] }
 0x613   :  { %2690 = vmatprep.subr.mxu0 %v2802_v3 }
 0x614   :  { %2691 = vmatpush3.msra.mxu0 %v2894_v8 }
 0x615   :  { %2693 = vmatmul.mubr.msk.f32.vlgmr.msra.gmra.mxu0 %vm33_vm0, %v2780_v35  ;;  %2706 = vmatprep.subr.mxu0 %v2802_v3 }
 0x616   :  { %2714 = vmatprep.mubr.msk.f32.mxu0 %vm2803_vm2, %v2802_v3 }
 0x6c5   :  { %v1655_v2 = vpop.f32.mrf.mxu0 }
 0x6c6   :  { %v1656_v19 = vadd.f32 %v3103_v57, %v1655_v2 }
 0x6c7   :  { %v2650_v54 = vpop.f32.mrf.mxu0 }
 0x6cd   :  { %v1800_v4 = vpop.f32.mrf.mxu0 }
 0x6ce   :  { %v1801_v20 = vadd.f32 %v1800_v4, %v1656_v19 }
 0x6cf   :  { %v2672_v21 = vpop.f32.mrf.mxu0 }
 0x6d0   :  { %2781 = vtanh.f32 %v1801_v20 }
 0x6d5   :  { %v1944_v22 = vpop.f32.mrf.mxu0 }
 0x6d6   :  { %v1948_v8 = vadd.f32 %v1944_v22, %v269_v6 }
 0x6d7   :  { %v2694_v23 = vpop.f32.mrf.mxu0 }
 0x6d8   :  { %2783 = vtanh.f32 %v1948_v8 }
 0x6dd   :  { %v2782_v24 = vpop.eup %2781 }
 0x6de   :  { %2682 = vmatmul.mubr.msk.f32.vlgmr.msra.gmra.mxu1 %vm33_vm0, %v2782_v24 }
 0x6df   :  { %2696 = vmatpush3.msra.mxu1 %v3031_v37  ;;  %2703 = vmatprep.mubr.msk.f32.mxu1 %vm2803_vm2, %v2802_v3  ;;  %v2027_v37 = vld [vmem:[%s3420_s3 + $0x18] sm:$0xff] }
 0x6e0   :  { %2697 = vmatprep.subr.mxu1 %v2802_v3  ;;  %2707 = vmatpush3.msra.mxu0 %v2027_v37 }
 0x6e1   :  { %2698 = vmatpush3.msra.mxu1 %v3039_v38  ;;  %v2026_v38 = vld [vmem:[%s3420_s3 + $0x10] sm:$0xff]  ;;  %2708 = vmatprep.subr.mxu0 %v2802_v3 }
 0x6e2   :  { %2699 = vmatprep.subr.mxu1 %v2802_v3  ;;  %2709 = vmatpush3.msra.mxu0 %v2026_v38 }
 0x6e3   :  { %2700 = vmatpush3.msra.mxu1 %v3049_v39  ;;  %v2025_v39 = vld [vmem:[%s3420_s3 + $0x8] sm:$0xff]  ;;  %2710 = vmatprep.subr.mxu0 %v2802_v3 }
 0x6e4   :  { %2701 = vmatprep.subr.mxu1 %v2802_v3  ;;  %2711 = vmatpush3.msra.mxu0 %v2025_v39 }
 0x6e5   :  { %v2784_v44 = vpop.eup %2783  ;;  %2702 = vmatpush3.msra.mxu1 %v3056_v40  ;;  %v2024_v40 = vld [vmem:[%s3420_s3] sm:$0xff]  ;;  %2712 = vmatprep.subr.mxu0 %v2802_v3 }
 0x6e6   :  { %2704 = vmatmul.mubr.msk.f32.vlgmr.msra.gmra.mxu1 %vm33_vm0, %v2784_v44  ;;  %2717 = vmatprep.subr.mxu1 %v2802_v3 }
 0x6e7   :  { %2749 = vmatprep.mubr.msk.f32.mxu1 %vm2803_vm2, %v2802_v3  ;;  %2713 = vmatpush3.msra.mxu0 %v2024_v40 }
 0x6e8   :  { %2718 = vmatpush3.msra.mxu1 %v2121_v53 }
 0x6e9   :  { %2719 = vmatprep.subr.mxu1 %v2802_v3 }
 0x6ea   :  { %2720 = vmatpush3.msra.mxu1 %v2120_v25 }
 0x6eb   :  { %2721 = vmatprep.subr.mxu1 %v2802_v3 }
 0x6ec   :  { %2722 = vmatpush3.msra.mxu1 %v2119_v26 }
 0x6ed   :  { %2723 = vmatprep.subr.mxu1 %v2802_v3 }
 0x6ee   :  { %2724 = vmatpush3.msra.mxu1 %v2118_v27 }
 0x6ef   :  { %2725 = vmatprep.subr.mxu1 %v2802_v3 }
 0x6f0   :  { %2726 = vmatpush3.msra.mxu1 %v2117_v28 }
 0x6f1   :  { %2727 = vmatprep.subr.mxu1 %v2802_v3 }
 0x6f2   :  { %2728 = vmatpush3.msra.mxu1 %v2116_v29 }
 0x6f3   :  { %2729 = vmatprep.subr.mxu1 %v2802_v3 }
 0x6f4   :  { %2730 = vmatpush3.msra.mxu1 %v2115_v31 }
 0x6f5   :  { %2731 = vmatprep.subr.mxu1 %v2802_v3 }
 0x6f6   :  { %2732 = vmatpush3.msra.mxu1 %v2114_v32 }
 0x6f7   :  { %2733 = vmatprep.subr.mxu1 %v2802_v3 }
 0x6f8   :  { %2734 = vmatpush3.msra.mxu1 %v2113_v33 }
 0x6f9   :  { %2735 = vmatprep.subr.mxu1 %v2802_v3 }
 0x6fa   :  { %2736 = vmatpush3.msra.mxu1 %v2112_v36 }
 0x6fb   :  { %2737 = vmatprep.subr.mxu1 %v2802_v3 }
 0x6fc   :  { %2738 = vmatpush3.msra.mxu1 %v2111_v41 }
 0x6fd   :  { %2739 = vmatprep.subr.mxu1 %v2802_v3 }
 0x6fe   :  { %2740 = vmatpush3.msra.mxu1 %v2110_v42 }
 0x6ff   :  { %2741 = vmatprep.subr.mxu1 %v2802_v3 }
 0x700   :  { %2742 = vmatpush3.msra.mxu1 %v2109_v43 }
 0x701   :  { %2743 = vmatprep.subr.mxu1 %v2802_v3 }
 0x702   :  { %2744 = vmatpush3.msra.mxu1 %v2108_v56 }
 0x703   :  { %2745 = vmatprep.subr.mxu1 %v2802_v3 }
 0x704   :  { %2746 = vmatpush3.msra.mxu1 %v2107_v52 }
 0x705   :  { %2747 = vmatprep.subr.mxu1 %v2802_v3 }
 0x79e   :  { %v1874_v45 = vpop.f32.mrf.mxu1 }
 0x79f   :  { %v1875_v47 = vadd.f32 %v3103_v57, %v1874_v45  ;;  %v2106_v57 = vld [vmem:[%s3420_s3 + $0x20] sm:$0xff] }
 0x7a0   :  { %v2683_v46 = vpop.f32.mrf.mxu1  ;;  %2748 = vmatpush3.msra.mxu1 %v2106_v57 }
 0x7a6   :  { %v2019_v48 = vpop.f32.mrf.mxu1 }
 0x7a7   :  { %v2020_v49 = vadd.f32 %v2019_v48, %v1875_v47 }
 0x7a8   :  { %v2705_v50 = vpop.f32.mrf.mxu1 }
 0x7a9   :  { %2785 = vtanh.f32 %v2020_v49 }
 0x7b6   :  { %v2786_v55 = vpop.eup %2785 }
 0x7b7   :  { %2715 = vmatmul.mubr.msk.f32.vlgmr.msra.gmra.mxu0 %vm33_vm0, %v2786_v55 }
 0x877   :  { %v2101_v59 = vpop.f32.mrf.mxu0 }
 0x878   :  { %v2102_v60 = vadd.f32 %v2265_v58, %v2101_v59 }
 0x879   :  { %v2716_v61 = vpop.f32.mrf.mxu0 }
 0x87a   :  { %v2105_v62 = vmax.f32 %v2102_v60, 0.0 }
 0x87c   :  { %2750 = vmatmul.mubr.f32.vlgmr.msra.gmra.mxu1 %v2105_v62 }
 0x93c   :  { %v2192_v0 = vpop.f32.mrf.mxu1 }
 0x93d   :  { %v2193_v3 = vadd.f32 %v2267_v63, %v2192_v0 }
 0x93e   :  { %v2751_v1 = vpop.f32.mrf.mxu1 }
 0x93f   :  { %2196 = vst [vmem:[%s3422_s5] sm:$0xff] %v2193_v3 }
 0x940   :  { %2201 = vsyncpa [#allocation4], 1 }

</bundles_post_ra>
